<compile_context>
chip_gen: v7x
topology: tpu7x:2x2x1
jax: 0.10.0
libtpu: 0.0.40
codegen_flags: <defaults>
</compile_context>

<pallas_src>
import math
from functools import partial

import numpy as np
import jax
import jax.numpy as jnp
from jax.experimental import pallas as pl
from jax.experimental.pallas import tpu as pltpu


# ----------------------------------------------------------------------------
# pltpu.roll direction probe (makes the shift convention-independent)
# ----------------------------------------------------------------------------
def _probe_roll_kernel(x_ref, o_ref):
    o_ref[...] = pltpu.roll(x_ref[...], 1, 1)


_ROLL_MATCHES_NP = None


def _roll_semantics_match_numpy():
    """Probe once whether pltpu.roll(x, s, axis) == np.roll(x, s, axis)."""
    global _ROLL_MATCHES_NP
    if _ROLL_MATCHES_NP is None:
        x = jnp.broadcast_to(jnp.arange(128, dtype=jnp.float32), (8, 128))
        out = pl.pallas_call(
            _probe_roll_kernel,
            out_shape=jax.ShapeDtypeStruct((8, 128), jnp.float32),
        )(x)
        _ROLL_MATCHES_NP = bool(np.asarray(out)[0, 1] == 0.0)
    return _ROLL_MATCHES_NP


# ----------------------------------------------------------------------------
# Kernel 1: fused Q / K / V / Pos projections, tiled over token rows
# ----------------------------------------------------------------------------
def _qkvp_proj_kernel(qx_ref, kx_ref, vx_ref, px_ref, w_ref, b_ref,
                      qo_ref, ko_ref, vo_ref, po_ref):
    def proj(x_ref, idx, o_ref):
        y = jnp.dot(x_ref[...], w_ref[idx],
                    preferred_element_type=jnp.float32) + b_ref[idx]
        o_ref[...] = y.astype(o_ref.dtype)

    proj(qx_ref, 0, qo_ref)
    proj(kx_ref, 1, ko_ref)
    proj(vx_ref, 2, vo_ref)
    proj(px_ref, 3, po_ref)


def _pick_row_tile(m):
    # prefer large row tiles, but keep >=2 grid steps so both v7x TCs get work
    for tm in (512, 256, 128):
        if m % tm == 0 and m // tm >= 2:
            return tm
    return m


def fused_qkvp_projection(qx, kx, vx, px, w_stack, b_stack):
    """qx/kx/vx/px: (M, D); w_stack: (4, D, D); b_stack: (4, 1, D) -> 4x (M, D)."""
    m, d = qx.shape
    tm = _pick_row_tile(m)
    row_spec = pl.BlockSpec((tm, d), lambda i: (i, 0))
    out = jax.ShapeDtypeStruct((m, d), jnp.float32)
    return pl.pallas_call(
        _qkvp_proj_kernel,
        out_shape=(out, out, out, out),
        grid=(m // tm,),
        in_specs=[
            row_spec, row_spec, row_spec, row_spec,
            pl.BlockSpec(w_stack.shape, lambda i: (0, 0, 0)),
            pl.BlockSpec(b_stack.shape, lambda i: (0, 0, 0)),
        ],
        out_specs=(row_spec, row_spec, row_spec, row_spec),
        compiler_params=pltpu.CompilerParams(
            dimension_semantics=("parallel",)),
    )(qx, kx, vx, px, w_stack, b_stack)


# ----------------------------------------------------------------------------
# Kernel 2: relative attention core + fused output projection, grid = (B,)
# ----------------------------------------------------------------------------
def _rel_attn_kernel(q_ref, k_ref, v_ref, p_ref, u_ref, vb_ref, mask_ref,
                     wo_ref, bo_ref, o_ref, *,
                     num_heads, inv_sqrt_dim, compute_dtype, roll_matches_np):
    T, D = q_ref.shape
    H = num_heads
    Dh = D // H
    cdt = compute_dtype

    def roll(x, shift, axis):
        # np.roll semantics: out[i] = x[(i - shift) % n]
        n = x.shape[axis]
        s = shift % n
        if s == 0:
            return x
        if not roll_matches_np:
            s = n - s
        return pltpu.roll(x, s, axis)

    # shared per-batch index tensors (hoisted out of the head loop)
    row = jax.lax.broadcasted_iota(jnp.int32, (T, T), 0)
    col = jax.lax.broadcasted_iota(jnp.int32, (T, T), 1)
    shift_amt = jnp.where(row == T - 1, 0, row + 1)          # (row + 1) mod T
    nbits = max((T - 1).bit_length(), 1)
    bit_on = [((shift_amt >> b) & 1) == 1 for b in range(nbits)]
    lower = col <= row                                       # keep row a of pos_score
    zero_diag = col == row + 1                               # exact zero column
    masked = mask_ref[0] != 0.0                              # (T, T) bool

    dn = (((1,), (1,)), ((), ()))                            # 'td,sd->ts'
    acc = jnp.zeros((T, D), jnp.float32)                     # fused out-proj accumulator

    for h in range(H):
        hs, he = h * Dh, (h + 1) * Dh
        q_h = q_ref[:, hs:he]                                # (T, Dh) f32
        # fold 1/sqrt(d_model) into the query terms (O(T*Dh) instead of O(T^2))
        qu_h = ((q_h + u_ref[:, hs:he]) * inv_sqrt_dim).astype(cdt)
        qv_h = ((q_h + vb_ref[:, hs:he]) * inv_sqrt_dim).astype(cdt)
        k_h = k_ref[:, hs:he].astype(cdt)
        p_h = p_ref[:, hs:he].astype(cdt)
        v_h = v_ref[:, hs:he].astype(cdt)

        content = jax.lax.dot_general(qu_h, k_h, dn,
                                      preferred_element_type=jnp.float32)
        pos_s = jax.lax.dot_general(qv_h, p_h, dn,
                                    preferred_element_type=jnp.float32)

        # Transformer-XL relative shift, O(T^2 log T):
        #   r[a, c] = pos_s[a, (c - a - 1) mod T]
        # per-row roll amount (a+1) decomposed into static power-of-two lane rolls
        r = pos_s
        for b in range(nbits):
            r = jnp.where(bit_on[b], roll(r, 1 << b, axis=1), r)
        r_up = roll(r, T - 1, axis=0)                        # r_up[a, :] = r[a+1, :]
        shifted = jnp.where(lower, r, jnp.where(zero_diag, 0.0, r_up))

        score = content + shifted
        score = jnp.where(masked, jnp.float32(-1e9), score)  # masked_fill semantics

        m = jnp.max(score, axis=-1, keepdims=True)
        e = jnp.exp(score - m)
        l = jnp.sum(e, axis=-1, keepdims=True)
        attn = (e * (1.0 / l)).astype(cdt)                   # one reciprocal per row
        # TODO(synk): attention dropout omitted (eval-mode / inference semantics).

        ctx_h = jnp.dot(attn, v_h, preferred_element_type=jnp.float32)     # (T, Dh)
        # fused output projection: ctx_full @ Wo == sum_h ctx_h @ Wo[h*Dh:(h+1)*Dh]
        acc = acc + jnp.dot(ctx_h.astype(cdt), wo_ref[hs:he, :].astype(cdt),
                            preferred_element_type=jnp.float32)

    o_ref[...] = (acc + bo_ref[...]).astype(o_ref.dtype)


def rel_attention_core(q2d, k2d, v2d, p2d, u_flat, v_flat, mask_f, wo, bo, *,
                       batch, seq_len, num_heads, d_model,
                       compute_dtype=jnp.bfloat16, roll_matches_np=None):
    """q2d/k2d/v2d/p2d: (B*T, D); mask_f: (B, T, T) f32 (nonzero = masked)."""
    T, D = seq_len, d_model
    M = batch * T
    if roll_matches_np is None:
        roll_matches_np = _roll_semantics_match_numpy()

    row_spec = pl.BlockSpec((T, D), lambda b: (b, 0))

    def bcast(shape):
        return pl.BlockSpec(shape, lambda b, _n=len(shape): (0,) * _n)

    kernel = partial(
        _rel_attn_kernel,
        num_heads=num_heads,
        inv_sqrt_dim=1.0 / math.sqrt(d_model),
        compute_dtype=compute_dtype,
        roll_matches_np=roll_matches_np,
    )
    # TODO(synk): for long sequences add a KV-tile grid axis with online softmax
    # (flash-style) so the full (T, T) score is never materialized.
    return pl.pallas_call(
        kernel,
        out_shape=jax.ShapeDtypeStruct((M, D), jnp.float32),
        grid=(batch,),
        in_specs=[
            row_spec, row_spec, row_spec, row_spec,              # q, k, v, p
            bcast((1, D)), bcast((1, D)),                        # u_bias, v_bias (lane-flat)
            pl.BlockSpec((1, T, T), lambda b: (b, 0, 0)),        # per-batch mask
            bcast((D, D)), bcast((1, D)),                        # out-proj weight / bias
        ],
        out_specs=row_spec,
        compiler_params=pltpu.CompilerParams(
            dimension_semantics=("parallel",)),
    )(q2d, k2d, v2d, p2d, u_flat, v_flat, mask_f, wo, bo)


# ----------------------------------------------------------------------------
# Module wrapper (deterministic synthetic parameters)
# ----------------------------------------------------------------------------
class RelativeMultiHeadAttentionPallas:
    def __init__(self, d_model=128, num_heads=4, dropout_p=0.1, key=None,
                 compute_dtype=jnp.bfloat16):
        assert d_model % num_heads == 0, "d_model % num_heads should be zero."
        self.d_model = d_model
        self.num_heads = num_heads
        self.d_head = d_model // num_heads
        self.sqrt_dim = math.sqrt(d_model)
        self.dropout_p = dropout_p          # unused: eval-mode semantics
        self.compute_dtype = compute_dtype

        key = jax.random.PRNGKey(0) if key is None else key
        ks = jax.random.split(key, 10)
        bound = 1.0 / math.sqrt(d_model)

        def lin(kw, kb):
            w = jax.random.uniform(kw, (d_model, d_model), jnp.float32, -bound, bound)
            b = jax.random.uniform(kb, (1, d_model), jnp.float32, -bound, bound)
            return w, b

        # weights stored as (d_in, d_out) so that y = x @ w + b
        self.wq, self.bq = lin(ks[0], ks[1])
        self.wk, self.bk = lin(ks[2], ks[3])
        self.wv, self.bv = lin(ks[4], ks[5])
        self.wp = jax.random.uniform(ks[6], (d_model, d_model), jnp.float32, -bound, bound)
        self.bp = jnp.zeros((1, d_model), jnp.float32)    # pos_proj has no bias
        self.wo, self.bo = lin(ks[7], ks[8])

        xav = math.sqrt(6.0 / (num_heads + self.d_head))  # xavier_uniform
        kb1, kb2 = jax.random.split(ks[9])
        self.u_bias = jax.random.uniform(kb1, (num_heads, self.d_head), jnp.float32, -xav, xav)
        self.v_bias = jax.random.uniform(kb2, (num_heads, self.d_head), jnp.float32, -xav, xav)

        # fused-projection weight/bias stacks + lane-flattened per-head biases
        self.w_stack = jnp.stack([self.wq, self.wk, self.wv, self.wp])   # (4, D, D)
        self.b_stack = jnp.stack([self.bq, self.bk, self.bv, self.bp])   # (4, 1, D)
        self.u_flat = self.u_bias.reshape(1, d_model)
        self.v_flat = self.v_bias.reshape(1, d_model)

        # probe pltpu.roll direction once (outside any jit trace)
        self._roll_np = _roll_semantics_match_numpy()

    def __call__(self, query, key, value, pos_embedding, mask=None):
        B, T, D = query.shape
        assert D == self.d_model
        assert T % 8 == 0 or B == 1, "sequence length must be a multiple of 8"

        q2d, k2d, v2d, p2d = fused_qkvp_projection(
            query.reshape(B * T, D), key.reshape(B * T, D),
            value.reshape(B * T, D), pos_embedding.reshape(B * T, D),
            self.w_stack, self.b_stack)

        if mask is None:
            mask_f = jnp.zeros((B, T, T), jnp.float32)
        else:
            mask_f = jnp.broadcast_to(mask, (B, T, T)).astype(jnp.float32)
        # TODO(synk): for pure key-padding masks this could be built in-kernel from
        # per-batch lengths via PrefetchScalarGridSpec instead of a (B,T,T) tensor.

        out2d = rel_attention_core(
            q2d, k2d, v2d, p2d, self.u_flat, self.v_flat, mask_f,
            self.wo, self.bo,
            batch=B, seq_len=T, num_heads=self.num_heads, d_model=self.d_model,
            compute_dtype=self.compute_dtype, roll_matches_np=self._roll_np)
        return out2d.reshape(B, T, D)


# ----------------------------------------------------------------------------
# Pure-JAX reference (mirrors the PyTorch forward) for a correctness check
# ----------------------------------------------------------------------------
def _rel_shift_ref(pos_score):
    B, H, T1, T2 = pos_score.shape
    zeros = jnp.zeros((B, H, T1, 1), pos_score.dtype)
    padded = jnp.concatenate([zeros, pos_score], axis=-1)
    padded = padded.reshape(B, H, T2 + 1, T1)
    return padded[:, :, 1:].reshape(B, H, T1, T2)


def reference_forward(mod, query, key, value, pos_embedding, mask=None):
    B, T, D = query.shape
    H, Dh = mod.num_heads, mod.d_head
    q = (query @ mod.wq + mod.bq).reshape(B, T, H, Dh)
    k = (key @ mod.wk + mod.bk).reshape(B, T, H, Dh).transpose(0, 2, 1, 3)
    v = (value @ mod.wv + mod.bv).reshape(B, T, H, Dh).transpose(0, 2, 1, 3)
    p = (pos_embedding @ mod.wp).reshape(B, T, H, Dh)

    content = jnp.matmul((q + mod.u_bias).transpose(0, 2, 1, 3), k.transpose(0, 1, 3, 2))
    pos_score = jnp.matmul((q + mod.v_bias).transpose(0, 2, 1, 3), p.transpose(0, 2, 3, 1))
    pos_score = _rel_shift_ref(pos_score)
    score = (content + pos_score) / mod.sqrt_dim
    if mask is not None:
        mm = jnp.broadcast_to(mask[:, None], score.shape)
        score = jnp.where(mm, jnp.float32(-1e9), score)
    attn = jax.nn.softmax(score, axis=-1)
    ctx = jnp.matmul(attn, v).transpose(0, 2, 1, 3).reshape(B, T, D)
    return ctx @ mod.wo + mod.bo


# ----------------------------------------------------------------------------
if __name__ == "__main__":
    B, T, d_model, num_heads = 2, 128, 128, 4

    root = jax.random.PRNGKey(0)
    kq, kk, kv, kp, kparam = jax.random.split(root, 5)
    query = jax.random.normal(kq, (B, T, d_model), jnp.float32)
    key = jax.random.normal(kk, (B, T, d_model), jnp.float32)
    value = jax.random.normal(kv, (B, T, d_model), jnp.float32)
    pos_emb = jax.random.normal(kp, (B, T, d_model), jnp.float32)

    # key-padding mask: (B, 1, T), True = masked position
    lengths = jnp.array([T, 93])
    mask = jnp.arange(T)[None, None, :] >= lengths[:, None, None]

    mod = RelativeMultiHeadAttentionPallas(d_model=d_model, num_heads=num_heads,
                                           dropout_p=0.1, key=kparam)
    out = jax.block_until_ready(mod(query, key, value, pos_emb, mask))
    assert out.shape == (B, T, d_model)

    ref = reference_forward(mod, query, key, value, pos_emb, mask)
    # bf16 MXU inputs (f32 accumulation / f32 softmax) -> loose-ish tolerance
    np.testing.assert_allclose(np.asarray(out), np.asarray(ref),
                               rtol=2e-2, atol=2e-2)

    print("KERNEL_OK")
</pallas_src>

<mosaic_0001>
module attributes {stable_mosaic.version = 11 : i64} {
  func.func @_probe_roll_kernel(%arg0: memref<8x128xf32, #tpu.memory_space<vmem>>, %arg1: memref<8x128xf32, #tpu.memory_space<vmem>>) attributes {dimension_semantics = [], scalar_prefetch = 0 : i64, scratch_operands = 0 : i64, tpu.core_type = #tpu.core_type<tc>} {
    %c0 = arith.constant 0 : index
    %c0_0 = arith.constant 0 : index
    %0 = vector.load %arg0[%c0, %c0_0] : memref<8x128xf32, #tpu.memory_space<vmem>>, vector<8x128xf32>
    %c1_i32 = arith.constant 1 : i32
    %1 = tpu.dynamic_rotate %0 by %c1_i32 dim 1 : vector<8x128xf32>, i32 -> vector<8x128xf32>
    %c0_1 = arith.constant 0 : index
    %c0_2 = arith.constant 0 : index
    %2 = vector.load %arg1[%c0_1, %c0_2] : memref<8x128xf32, #tpu.memory_space<vmem>>, vector<8x128xf32>
    tpu.vector_store %arg1[%c0_1, %c0_2], %1 {strides = array<i32>} : memref<8x128xf32, #tpu.memory_space<vmem>>, vector<8x128xf32>,
    return
  }
}

</mosaic_0001>

<bundles_post_ra>
// kernel: tpu_custom_call.1
= control target key start
LH: loop header
LB: loop body
LE: loop exit
PB: predicated region body
PF: predicated region fallthrough
CT: control target
= control target key end

     0   :  { %6 = vsyncpa [#allocation3], 0  ;;  %s128_s0 = inlined_call_operand.hbm [shape: f32[8,128], index: 0, kind: input, shape index: {}]   ;;  %s129_s1 = inlined_call_operand.hbm [shape: f32[8,128], index: 1, kind: output, shape index: {}]  }
   0x1   :  { %7 = vsyncpa [#allocation4], 0  ;;  %s91_s6 = smov [#allocation2]   ;;  %s43_s10 = scalar_lea.hbm %s128_s0, 128 }
   0x2   :  { %s14_s7 = sshll.u32 %s91_s6, 4  ;;  %p44_p0 = scmp.ne.s32.totalorder %s128_s0, %s43_s10  ;;  %s15_s7 = int_to_ptr.vmem [resolvable:$true] %s14_s7 }
   0x3   :  { %p47_p1 = scmp.lt.u32.totalorder %s43_s10, %s128_s0 }
   0x5   :  { %p49_p2 = pnand %p47_p1, %p44_p0 }
   0x7   :  { %52 = shalt.err (!%p49_p2)
}
   0x8   :  { %s53_s15 = scalar_lea.vmem %s15_s7, 128  ;;  %p58_p4 = scmp.lt.s32.totalorder %s15_s7, %s15_s7 }
   0x9   :  { %p54_p3 = scmp.ne.s32.totalorder %s15_s7, %s53_s15  ;;  %p59_p5 = scmp.lt.s32.totalorder %s53_s15, %s53_s15 }
   0xb   :  { %p60_p6 = por %p59_p5, %p58_p4 }
   0xd   :  { %p61_p7 = pnand %p60_p6, %p54_p3 }
   0xf   :  { %64 = shalt.err (!%p61_p7)
}
  0x10   :  { %17 = dma.hbm_to_vmem [thread:$0]  %s128_s0, 128, %s15_s7, [#allocation3]  }
  0x11   :  { %87 = dma.done.wait [#allocation3], 128  }
  0x12   :  { %88 = vsyncadd [#allocation3], 4294967168  ;;  %v21_v0 = vld [vmem:[#allocation2] sm:$0xff]  ;;  %s92_s18 = smov 1   ;;  %s93_s19 = smov [#allocation5]  }
  0x13   :  { %22 = vrot.lane.b32.xlu0 %v21_v0, %s92_s18  ;;  %s31_s20 = sshll.u32 %s93_s19, 4  ;;  %s32_s20 = int_to_ptr.vmem [resolvable:$true] %s31_s20 }
  0x14   :  { %s65_s21 = scalar_lea.vmem %s32_s20, 128  ;;  %p70_p9 = scmp.lt.s32.totalorder %s32_s20, %s32_s20 }
  0x15   :  { %p66_p8 = scmp.ne.s32.totalorder %s32_s20, %s65_s21  ;;  %p71_p10 = scmp.lt.s32.totalorder %s65_s21, %s65_s21 }
  0x17   :  { %p72_p11 = por %p71_p10, %p70_p9 }
  0x19   :  { %p73_p12 = pnand %p72_p11, %p66_p8 }
  0x85   :  { %v23_v1 = vpop.permute.xlu0 %22 }
  0x86   :  { %24 = vst [vmem:[#allocation5] sm:$0xff] %v23_v1 }
  0x87   :  { %76 = shalt.err (!%p73_p12)
}
  0x88   :  { %s77_s0 = scalar_lea.hbm %s129_s1, 128 }
  0x89   :  { %p78_p13 = scmp.ne.s32.totalorder %s129_s1, %s77_s0  ;;  %p81_p0 = scmp.lt.u32.totalorder %s77_s0, %s129_s1 }
  0x8b   :  { %p83_p1 = pnand %p81_p0, %p78_p13 }
  0x8d   :  { %86 = shalt.err (!%p83_p1)
}
  0x8e   :  { %34 = dma.vmem_to_hbm [thread:$0]  %s32_s20, 128, %s129_s1, [#allocation4]  }
  0x8f   :  { %89 = dma.done.wait [#allocation4], 128  }
  0x90   :  { %90 = vsyncadd [#allocation4], 4294967168 }
  0x91   :  { %38 = vsyncpa [#allocation3], 1 }
  0x92   :  { %39 = vsyncpa [#allocation4], 1 }

</bundles_post_ra>
